<compile_context>
chip_gen: v5e
topology: v5e:2x2
jax: 0.10.0
libtpu: 0.0.40
codegen_flags: <defaults>
</compile_context>

<pallas_src>
import functools

import jax
import jax.numpy as jnp
from jax.experimental import pallas as pl
from jax.experimental.pallas import tpu as pltpu

K_SIZE = 3  # ECA default kernel size; padding = (k_size - 1) // 2 = 1.


def _eca_gate_kernel(w_ref, x_ref, g_ref, acc_ref, *, inv_hw):
    """Grid (B, n_hw_tiles): gate[b] = sigmoid(conv1d_k3(avgpool(x[b]))).

    w_ref  : SMEM (3,) f32            conv1d weight (no bias)
    x_ref  : VMEM (1, C, hw_tile)     spatial tile of x[b]
    g_ref  : VMEM (1, C, 1) f32       per-channel gate (written at last tile)
    acc_ref: VMEM (C + 2, 1) f32      zero-padded running per-channel sum
    """
    t = pl.program_id(1)
    c = x_ref.shape[1]

    @pl.when(t == 0)
    def _init():
        # Rows 0 and C+1 stay zero -> they are the conv's zero padding.
        acc_ref[...] = jnp.zeros_like(acc_ref)

    # Partial per-channel sum over this spatial tile (lane-axis reduce, f32).
    x = x_ref[0]                                            # (C, hw_tile)
    acc_ref[pl.ds(1, c), :] += jnp.sum(
        x.astype(jnp.float32), axis=1, keepdims=True)       # (C, 1)

    @pl.when(t == pl.num_programs(1) - 1)
    def _finalize():
        # Shift-based k=3 conv along channels with zero padding:
        # the three overlapping windows of the padded accumulator are the
        # -1 / 0 / +1 channel shifts.  O(C) work, no band matrix, no matmul.
        left = acc_ref[pl.ds(0, c), :]    # sum[i-1]  (0 at i = 0)
        mid = acc_ref[pl.ds(1, c), :]     # sum[i]
        right = acc_ref[pl.ds(2, c), :]   # sum[i+1]  (0 at i = C-1)
        y = (w_ref[0] * left + w_ref[1] * mid + w_ref[2] * right) * inv_hw
        g_ref[0] = jax.nn.sigmoid(y)      # (C, 1)


def _eca_scale_kernel(g_ref, x_ref, o_ref):
    """Grid (B, n_hw_tiles): o = x * gate (per-channel lane broadcast)."""
    o_ref[...] = x_ref[...] * g_ref[...].astype(x_ref.dtype)


def _pick_hw_tile(c, hw, itemsize, target_block_bytes=2 << 20):
    """Largest spatial tile (multiple of 128 that divides hw) within budget."""
    if c * hw * itemsize <= 2 * target_block_bytes or hw % 128 != 0:
        return hw  # small enough (or not 128-aligned): take the full map
    cap = max(128, (target_block_bytes // (c * itemsize)) // 128 * 128)
    t = min(hw, cap)
    t -= t % 128
    while t >= 128:
        if hw % t == 0:
            return t
        t -= 128
    return hw


def eca_forward(x, conv_weight):
    """x: (B, C, H, W); conv_weight: (K_SIZE,) float32. Returns x * gate."""
    b, c, h, w = x.shape
    hw = h * w
    itemsize = x.dtype.itemsize
    x3 = x.reshape(b, c, hw)                     # lane-dense spatial axis
    hw_tile = _pick_hw_tile(c, hw, itemsize)
    n_t = hw // hw_tile

    # ---- phase 1: per-channel gates (B, C, 1), f32 --------------------------
    gates = pl.pallas_call(
        functools.partial(_eca_gate_kernel, inv_hw=1.0 / hw),
        out_shape=jax.ShapeDtypeStruct((b, c, 1), jnp.float32),
        grid_spec=pltpu.PrefetchScalarGridSpec(
            num_scalar_prefetch=0,
            grid=(b, n_t),
            in_specs=[
                pl.BlockSpec(memory_space=pltpu.MemorySpace.SMEM),   # weights
                pl.BlockSpec((1, c, hw_tile), lambda i, t: (i, 0, t)),
            ],
            out_specs=pl.BlockSpec((1, c, 1), lambda i, t: (i, 0, 0)),
            scratch_shapes=[pltpu.VMEM((c + 2, 1), jnp.float32)],
        ),
        compiler_params=pltpu.CompilerParams(
            dimension_semantics=("parallel", "arbitrary")),
        cost_estimate=pl.CostEstimate(
            flops=int(2 * b * c * hw + 8 * b * c),
            transcendentals=int(b * c),
            bytes_accessed=int(b * c * hw * itemsize + b * c * 4),
        ),
    )(conv_weight, x3)

    # ---- phase 2: lane-dense broadcast rescale -------------------------------
    out3 = pl.pallas_call(
        _eca_scale_kernel,
        out_shape=jax.ShapeDtypeStruct((b, c, hw), x.dtype),
        grid_spec=pltpu.PrefetchScalarGridSpec(
            num_scalar_prefetch=0,
            grid=(b, n_t),
            in_specs=[
                pl.BlockSpec((1, c, 1), lambda i, t: (i, 0, 0)),         # gate
                pl.BlockSpec((1, c, hw_tile), lambda i, t: (i, 0, t)),   # x
            ],
            out_specs=pl.BlockSpec((1, c, hw_tile), lambda i, t: (i, 0, t)),
        ),
        compiler_params=pltpu.CompilerParams(
            dimension_semantics=("parallel", "parallel")),
        cost_estimate=pl.CostEstimate(
            flops=int(b * c * hw),
            transcendentals=0,
            bytes_accessed=int(2 * b * c * hw * itemsize + b * c * 4),
        ),
    )(gates, x3)

    return out3.reshape(b, c, h, w)


def eca_reference(x, conv_weight):
    """Pure-JAX reference matching the PyTorch ECAModule forward."""
    c = x.shape[1]
    pooled = jnp.mean(x.astype(jnp.float32), axis=(2, 3))        # (B, C)
    padded = jnp.pad(pooled, ((0, 0), (1, 1)))                    # (B, C+2)
    y = (conv_weight[0] * padded[:, 0:c]
         + conv_weight[1] * padded[:, 1:c + 1]
         + conv_weight[2] * padded[:, 2:c + 2])
    y = jax.nn.sigmoid(y)
    return x * y[:, :, None, None].astype(x.dtype)


if __name__ == "__main__":
    key = jax.random.PRNGKey(0)
    kx, kw = jax.random.split(key)

    # Small but representative ECA shapes (C=128 is a typical ResNet stage width).
    B, C, H, W = 2, 128, 16, 16
    x = jax.random.normal(kx, (B, C, H, W), dtype=jnp.float32)

    # Deterministic Conv1d(1, 1, k=3, bias=False) weight, ~kaiming-uniform range.
    fan_in = 1 * K_SIZE
    bound = (1.0 / fan_in) ** 0.5
    conv_weight = jax.random.uniform(
        kw, (K_SIZE,), minval=-bound, maxval=bound, dtype=jnp.float32)

    out = jax.block_until_ready(eca_forward(x, conv_weight))
    ref = eca_reference(x, conv_weight)

    assert out.shape == x.shape and out.dtype == x.dtype
    assert jnp.allclose(out, ref, atol=1e-5, rtol=1e-5), "mismatch vs reference"
    print("KERNEL_OK")
</pallas_src>

<mosaic_0001>
module attributes {stable_mosaic.version = 11 : i64} {
  func.func @_eca_gate_kernel(%arg0: i32, %arg1: i32, %arg2: memref<3xf32, #tpu.memory_space<smem>>, %arg3: memref<1x128x256xf32, #tpu.memory_space<vmem>>, %arg4: memref<1x128x1xf32, #tpu.memory_space<vmem>>, %arg5: memref<130x1xf32, #tpu.memory_space<vmem>>) attributes {dimension_semantics = [#tpu.dimension_semantics<parallel>, #tpu.dimension_semantics<arbitrary>], iteration_bounds = array<i64: 2, 1>, scalar_prefetch = 0 : i64, scratch_operands = 1 : i64, tpu.core_type = #tpu.core_type<tc>, window_params = [{transform_indices = @transform_0, window_bounds = array<i64: 3>}, {transform_indices = @transform_1, window_bounds = array<i64: 1, 128, 256>}, {transform_indices = @transform_2, window_bounds = array<i64: 1, 128, 1>}]} {
    %c0_i32 = arith.constant 0 : i32
    %0 = arith.cmpi eq, %arg1, %c0_i32 : i32
    %1 = arith.extui %0 : i1 to i32
    %c0_i32_0 = arith.constant 0 : i32
    %2 = arith.cmpi ne, %1, %c0_i32_0 : i32
    scf.if %2 {
      %cst_8 = arith.constant 0.000000e+00 : f32
      %13 = vector.broadcast %cst_8 : f32 to vector<130x1xf32>
      %c0_9 = arith.constant 0 : index
      %c0_10 = arith.constant 0 : index
      %14 = vector.load %arg5[%c0_9, %c0_10] : memref<130x1xf32, #tpu.memory_space<vmem>>, vector<130x1xf32>
      tpu.vector_store %arg5[%c0_9, %c0_10], %13 {strides = array<i32>} : memref<130x1xf32, #tpu.memory_space<vmem>>, vector<130x1xf32>,
    } else {
    }
    %c0 = arith.constant 0 : index
    %c0_1 = arith.constant 0 : index
    %c0_2 = arith.constant 0 : index
    %3 = vector.load %arg3[%c0, %c0_1, %c0_2] : memref<1x128x256xf32, #tpu.memory_space<vmem>>, vector<1x128x256xf32>
    %4 = vector.shape_cast %3 : vector<1x128x256xf32> to vector<128x256xf32>
    %c1 = arith.constant 1 : index
    %c0_3 = arith.constant 0 : index
    %5 = vector.load %arg5[%c1, %c0_3] : memref<130x1xf32, #tpu.memory_space<vmem>>, vector<128x1xf32>
    %cst = arith.constant dense<0.000000e+00> : vector<128xf32>
    %6 = vector.multi_reduction <add>, %4, %cst [1] : vector<128x256xf32> to vector<128xf32>
    %7 = vector.shape_cast %6 : vector<128xf32> to vector<128x1xf32>
    %8 = arith.addf %5, %7 : vector<128x1xf32>
    %c1_4 = arith.constant 1 : index
    %c0_5 = arith.constant 0 : index
    %9 = vector.load %arg5[%c1_4, %c0_5] : memref<130x1xf32, #tpu.memory_space<vmem>>, vector<128x1xf32>
    tpu.vector_store %arg5[%c1_4, %c0_5], %8 {strides = array<i32>} : memref<130x1xf32, #tpu.memory_space<vmem>>, vector<128x1xf32>,
    %c0_i32_6 = arith.constant 0 : i32
    %10 = arith.cmpi eq, %arg1, %c0_i32_6 : i32
    %11 = arith.extui %10 : i1 to i32
    %c0_i32_7 = arith.constant 0 : i32
    %12 = arith.cmpi ne, %11, %c0_i32_7 : i32
    scf.if %12 {
      %c0_8 = arith.constant 0 : index
      %c0_9 = arith.constant 0 : index
      %13 = vector.load %arg5[%c0_8, %c0_9] : memref<130x1xf32, #tpu.memory_space<vmem>>, vector<128x1xf32>
      %c1_10 = arith.constant 1 : index
      %c0_11 = arith.constant 0 : index
      %14 = vector.load %arg5[%c1_10, %c0_11] : memref<130x1xf32, #tpu.memory_space<vmem>>, vector<128x1xf32>
      %c2 = arith.constant 2 : index
      %c0_12 = arith.constant 0 : index
      %15 = vector.load %arg5[%c2, %c0_12] : memref<130x1xf32, #tpu.memory_space<vmem>>, vector<128x1xf32>
      %c0_13 = arith.constant 0 : index
      %16 = memref.load %arg2[%c0_13] : memref<3xf32, #tpu.memory_space<smem>>
      %17 = vector.broadcast %16 : f32 to vector<128x1xf32>
      %18 = arith.mulf %17, %13 : vector<128x1xf32>
      %c1_14 = arith.constant 1 : index
      %19 = memref.load %arg2[%c1_14] : memref<3xf32, #tpu.memory_space<smem>>
      %20 = vector.broadcast %19 : f32 to vector<128x1xf32>
      %21 = arith.mulf %20, %14 : vector<128x1xf32>
      %22 = arith.addf %18, %21 : vector<128x1xf32>
      %c2_15 = arith.constant 2 : index
      %23 = memref.load %arg2[%c2_15] : memref<3xf32, #tpu.memory_space<smem>>
      %24 = vector.broadcast %23 : f32 to vector<128x1xf32>
      %25 = arith.mulf %24, %15 : vector<128x1xf32>
      %26 = arith.addf %22, %25 : vector<128x1xf32>
      %cst_16 = arith.constant 3.906250e-03 : f32
      %27 = vector.broadcast %cst_16 : f32 to vector<128x1xf32>
      %28 = arith.mulf %26, %27 : vector<128x1xf32>
      %29 = arith.negf %28 : vector<128x1xf32>
      %30 = math.exp %29 : vector<128x1xf32>
      %cst_17 = arith.constant 1.000000e+00 : f32
      %31 = vector.broadcast %cst_17 : f32 to vector<128x1xf32>
      %32 = arith.addf %31, %30 : vector<128x1xf32>
      %33 = arith.divf %31, %32 : vector<128x1xf32>
      %c0_18 = arith.constant 0 : index
      %c0_19 = arith.constant 0 : index
      %c0_20 = arith.constant 0 : index
      %34 = vector.load %arg4[%c0_18, %c0_19, %c0_20] : memref<1x128x1xf32, #tpu.memory_space<vmem>>, vector<1x128x1xf32>
      %35 = vector.shape_cast %34 : vector<1x128x1xf32> to vector<128x1xf32>
      %36 = vector.shape_cast %33 : vector<128x1xf32> to vector<1x128x1xf32>
      tpu.vector_store %arg4[%c0_18, %c0_19, %c0_20], %36 {strides = array<i32>} : memref<1x128x1xf32, #tpu.memory_space<vmem>>, vector<1x128x1xf32>,
    } else {
    }
    return
  }
  func.func @transform_0(%arg0: i32, %arg1: i32) -> i32 {
    %c0_i32 = arith.constant 0 : i32
    %c0_i32_0 = arith.constant 0 : i32
    return %c0_i32 : i32
  }
  func.func @transform_1(%arg0: i32, %arg1: i32) -> (i32, i32, i32) {
    %c0_i32 = arith.constant 0 : i32
    %c0_i32_0 = arith.constant 0 : i32
    return %arg0, %c0_i32, %arg1 : i32, i32, i32
  }
  func.func @transform_2(%arg0: i32, %arg1: i32) -> (i32, i32, i32) {
    %c0_i32 = arith.constant 0 : i32
    %c0_i32_0 = arith.constant 0 : i32
    %c0_i32_1 = arith.constant 0 : i32
    return %arg0, %c0_i32, %c0_i32_0 : i32, i32, i32
  }
}

</mosaic_0001>

<bundles_post_ra>
// kernel: tpu_custom_call.1
= control target key start
LH: loop header
LB: loop body
LE: loop exit
PB: predicated region body
PF: predicated region fallthrough
CT: control target
= control target key end

     0   :  { %7 = vsyncpa [#allocation5], 0  ;;  %s1683_s0 = inlined_call_operand.hbm [shape: f32[3], index: 0, kind: input, shape index: {}]   ;;  %s1684_s1 = inlined_call_operand.hbm [shape: f32[2,128,256], index: 1, kind: input, shape index: {}]   ;;  %s1685_s2 = inlined_call_operand.vmem [shape: f32[2,128,1], index: 2, kind: output, shape index: {}]  }
   0x1   :  { %8 = vsyncpa [#allocation4], 0 }
   0x2   :  { %10 = vsyncpa [#allocation4 + $0x1], 0  ;;  %s1200_s9 = smov 0   ;;  %s1202_s10 = smov 0  }
   0x3   :  { %s1204_s11 = smov 0   ;;  %s1206_s12 = smov 0  }
   0x4   :  { %s1208_s13 = smov 0   ;;  %s1210_s14 = smov 0  }
   0x5 LB: > { %s912_s15 = sadd.s32 4294967295, %s1179_s14   ;;  %s58_s16 = sadd.s32 1, %s1167_s11  ;;  %s1179_s14 = sphi %s1210_s14, %s16_s14   ;;  %s1175_s13 = sphi %s1208_s13, %s1710_s13   ;;  %s1171_s12 = sphi %s1206_s12, %s1709_s12   ;;  %s1167_s11 = sphi %s1204_s11, %s1708_s11   ;;  %s1163_s10 = sphi %s1202_s10, %s1707_s10   ;;  %s1159_s9 = sphi %s1200_s9, %s1706_s9  }
   0x6   : > { %p65_p0 = scmp.ne.s32.totalorder %s1167_s11, %s1163_s10  ;;  %p66_p1 = scmp.eq.s32.totalorder %s1179_s14, 0 }
   0x7   : > { %p71_p2 = scmp.ne.s32.totalorder %s1163_s10, %s1159_s9  ;;  %p1234_p3 = scmp.eq.s32.totalorder %s912_s15, 0 }
   0x8   : > { %p67_p4 = por %p66_p1, %p65_p0  ;;  %p914_p5 = scmp.ge.s32.totalorder %s1179_s14, 1 }
   0x9   : > { %p1241_p6 = por %p1234_p3, %p71_p2  ;;  %p108_p7 = scmp.lt.s32.totalorder %s1179_s14, 3 }
   0xa   : > { %s120_s21 = sshll.u32 %s1683_s0, 4  ;;  %p962_p10 = scmp.lt.s32.totalorder %s1179_s14, 2  ;;  %s121_s21 = int_to_ptr.hbm [resolvable:$true] %s120_s21 }
   0xb   : > { %p1249_p8 = pnand %p914_p5, %p108_p7  ;;  %s131_s23 = sand.u32 1, %s1167_s11  }
   0xc   : > { %p1259_p12 = pnand %p962_p10, %p67_p4  ;;  %s1181_s25 = smov [#allocation3]  }
   0xd   : > { %p953_p9 = pneg %p1249_p8  ;;  %s28_s26 = sadd.s32 1, %s1175_s13 }
   0xe   : > { %s917_s27 = sshll.u32 %s131_s23, 8  ;;  %p30_p13 = scmp.ge.s32.totalorder %s28_s26, 2 }
   0xf   : > { %p954_p11 = pnand %p953_p9, %p1234_p3  ;;  %s945_s28 = sshll.u32 %s1175_s13, 8 }
  0x10   : > { %s135_s29 = scalar_lea.vmem [#allocation6], %s917_s27  ;;  %s1712_s26 = smov (%p30_p13, %s28_s26), 0 }
  0x11   : > { %956 = dma.hbm_to_smem (!%p954_p11), %s121_s21, 16, %s1181_s25, [#allocation5]  }
  0x12   : > { %s145_s30 = sshll.u32 %s135_s29, 4  ;;  %s142_s5 = scalar_lea.hbm %s1684_s1, %s945_s28  ;;  %s146_s30 = int_to_ptr.vmem [resolvable:$true] %s145_s30 }
  0x13   : > { %s53_s6 = ssub.s32 %s1175_s13, %s1712_s26  ;;  %s143_s7 = sshll.u32 %s142_s5, 4  ;;  %s144_s7 = int_to_ptr.hbm [resolvable:$true] %s143_s7 }
  0x14   : > { %p56_p0 = scmp.eq.s32.totalorder %s53_s6, 0  ;;  %s132_s9 = scalar_lea.sflag [#allocation4], %s131_s23 }
  0x15   : > { %s1182_s15 = smov 256   ;;  %s1183_s19 = smov 16  }
  0x16   : > { %s1275_s8 = scalar_select %p56_p0, %s1167_s11, %s58_s16  }
  0x17   : > { %960 = dma.hbm_to_vmem [thread:$0]  (!%p1259_p12), %s144_s7, 4096, %s146_s30, %s132_s9, %s1182_s15, %s1182_s15, %s1183_s19  }
  0x18   : > { %157 = sbr.rel (%p1249_p8) target bundleno = 282 (0x11a), region = 28 }
  0x1d   : > { %1150 = dma.done.wait (%p1234_p3), [#allocation5], 16  }
  0x1e   : > { %1152 = vsyncadd (%p1234_p3), [#allocation5], 4294967280  ;;  %s164_s20 = sand.u32 1, %s1163_s10  }
  0x1f   : > { %s922_s21 = sshll.u32 %s164_s20, 8  ;;  %s165_s16 = scalar_lea.sflag [#allocation4], %s164_s20 }
  0x20   : > { %s1286_s25 = scalar_lea.vmem [#allocation6], %s922_s21 }
  0x21   : > { %1154 = dma.done.wait (%p1241_p6), %s165_s16, 4096  }
  0x22   : > { %1156 = vsyncadd (%p1241_p6), %s165_s16, 4294963200 }
  0x23   : > { %174 = sfence }
  0x24   : > { %v228_v0 = vld [vmem:[%s1286_s25 + $0x40] sm:$0xff]  ;;  %v229_v1 = vld [vmem:[%s1286_s25 + $0x48] sm:$0xff]  ;;  %v230_v9 = vld [vmem:[%s1286_s25 + $0x50] sm:$0xff]  ;;  %vm201_vm0 = vcmask 7168   ;;  %v1184_v48 = vmov 0.0   ;;  %s925_s17 = sld [smem:[#allocation3 + $0x1]] }
  0x25   : > { %v224_v2 = vld [vmem:[%s1286_s25 + $0x20] sm:$0xff]  ;;  %v280_v3 = vadd.f32 %v229_v1, %v228_v0  ;;  %v225_v4 = vld [vmem:[%s1286_s25 + $0x28] sm:$0xff]  ;;  %v231_v10 = vld [vmem:[%s1286_s25 + $0x58] sm:$0xff]  ;;  %206 = vst.msk [vmem:[#allocation2 + $0x20] sm:$0xff] %vm201_vm0, %v1184_v48  ;;  %s400_s18 = sld [smem:[#allocation3]]  ;;  %vm218_vm1 = vcmask 1024  }
  0x26   : > { %v220_v5 = vld [vmem:[%s1286_s25] sm:$0xff]  ;;  %v221_v6 = vld [vmem:[%s1286_s25 + $0x8] sm:$0xff]  ;;  %v274_v7 = vadd.f32 %v225_v4, %v224_v2  ;;  %v226_v11 = vld [vmem:[%s1286_s25 + $0x30] sm:$0xff]  ;;  %v283_v15 = vadd.f32 %v231_v10, %v230_v9  ;;  %207 = vst.msk [vmem:[#allocation2 + $0x28] sm:$0xff] %vm201_vm0, %v1184_v48  ;;  %s926_s22 = sld [smem:[#allocation3 + $0x2]]  ;;  %p192_p1 = scmp.lt.s32.totalorder %s1171_s12, 1 }
  0x27   : > { %v268_v8 = vadd.f32 %v221_v6, %v220_v5  ;;  %281 = vadd.xlane.f32.xlu2 %v280_v3  ;;  %v227_v12 = vld [vmem:[%s1286_s25 + $0x38] sm:$0xff]  ;;  %v222_v13 = vld [vmem:[%s1286_s25 + $0x10] sm:$0xff]  ;;  %v236_v19 = vld [vmem:[%s1286_s25 + $0x80] sm:$0xff]  ;;  %202 = vst.msk [vmem:[#allocation2] sm:$0xff] %vm201_vm0, %v1184_v48 }
  0x28   : > { %275 = vadd.xlane.f32.xlu1 %v274_v7  ;;  %v223_v14 = vld [vmem:[%s1286_s25 + $0x18] sm:$0xff]  ;;  %v277_v16 = vadd.f32 %v227_v12, %v226_v11  ;;  %v234_v18 = vld [vmem:[%s1286_s25 + $0x70] sm:$0xff]  ;;  %v237_v20 = vld [vmem:[%s1286_s25 + $0x88] sm:$0xff]  ;;  %203 = vst.msk [vmem:[#allocation2 + $0x8] sm:$0xff] %vm201_vm0, %v1184_v48  ;;  %s1714_s12 = smov (!%p192_p1, %s1171_s12), 1 }
  0x29   : > { %269 = vadd.xlane.f32.xlu0 %v268_v8  ;;  %v271_v17 = vadd.f32 %v223_v14, %v222_v13  ;;  %v235_v21 = vld [vmem:[%s1286_s25 + $0x78] sm:$0xff]  ;;  %v232_v22 = vld [vmem:[%s1286_s25 + $0x60] sm:$0xff]  ;;  %v233_v23 = vld [vmem:[%s1286_s25 + $0x68] sm:$0xff]  ;;  %v292_v24 = vadd.f32 %v237_v20, %v236_v19  ;;  %204 = vst.msk [vmem:[#allocation2 + $0x10] sm:$0xff] %vm201_vm0, %v1184_v48  ;;  %s946_s23 = sshll.u32 %s1714_s12, 7 }
  0x2a   : > { %v289_v25 = vadd.f32 %v235_v21, %v234_v18  ;;  %v286_v26 = vadd.f32 %v233_v23, %v232_v22  ;;  %v240_v27 = vld [vmem:[%s1286_s25 + $0xa0] sm:$0xff]  ;;  %v242_v28 = vld [vmem:[%s1286_s25 + $0xb0] sm:$0xff]  ;;  %v243_v29 = vld [vmem:[%s1286_s25 + $0xb8] sm:$0xff]  ;;  %205 = vst.msk [vmem:[#allocation2 + $0x18] sm:$0xff] %vm201_vm0, %v1184_v48  ;;  %v1362_v7 = vstv %s925_s17  ;;  %s1490_s27 = scalar_lea.vmem %s1685_s2, %s946_s23 }
  0x2b   : > { %v241_v30 = vld [vmem:[%s1286_s25 + $0xa8] sm:$0xff]  ;;  %v238_v31 = vld [vmem:[%s1286_s25 + $0x90] sm:$0xff]  ;;  %v239_v32 = vld [vmem:[%s1286_s25 + $0x98] sm:$0xff]  ;;  %v301_v33 = vadd.f32 %v243_v29, %v242_v28  ;;  %208 = vst.msk [vmem:[#allocation2 + $0x30] sm:$0xff] %vm201_vm0, %v1184_v48  ;;  %v1364_v8 = vstv %s400_s18 }
  0x2c   : > { %v298_v34 = vadd.f32 %v241_v30, %v240_v27  ;;  %v295_v35 = vadd.f32 %v239_v32, %v238_v31  ;;  %v246_v36 = vld [vmem:[%s1286_s25 + $0xd0] sm:$0xff]  ;;  %v248_v37 = vld [vmem:[%s1286_s25 + $0xe0] sm:$0xff]  ;;  %v249_v38 = vld [vmem:[%s1286_s25 + $0xe8] sm:$0xff]  ;;  %209 = vst.msk [vmem:[#allocation2 + $0x38] sm:$0xff] %vm201_vm0, %v1184_v48 }
  0x2d   : > { %v247_v39 = vld [vmem:[%s1286_s25 + $0xd8] sm:$0xff]  ;;  %v244_v40 = vld [vmem:[%s1286_s25 + $0xc0] sm:$0xff]  ;;  %v245_v41 = vld [vmem:[%s1286_s25 + $0xc8] sm:$0xff]  ;;  %v310_v42 = vadd.f32 %v249_v38, %v248_v37  ;;  %210 = vst.msk [vmem:[#allocation2 + $0x40] sm:$0xff] %vm201_vm0, %v1184_v48 }
  0x2e   : > { %v307_v43 = vadd.f32 %v247_v39, %v246_v36  ;;  %v304_v44 = vadd.f32 %v245_v41, %v244_v40  ;;  %v250_v45 = vld [vmem:[%s1286_s25 + $0xf0] sm:$0xff]  ;;  %v251_v46 = vld [vmem:[%s1286_s25 + $0xf8] sm:$0xff]  ;;  %211 = vst.msk [vmem:[#allocation2 + $0x48] sm:$0xff] %vm201_vm0, %v1184_v48 }
  0x2f   : > { %284 = vadd.xlane.f32.xlu2 %v283_v15  ;;  %v313_v47 = vadd.f32 %v251_v46, %v250_v45  ;;  %212 = vst.msk [vmem:[#allocation2 + $0x50] sm:$0xff] %vm201_vm0, %v1184_v48  ;;  %v256_v49 = vld [vmem:[#allocation2 + $0x21] sm:$0xff] }
  0x30   : > { %278 = vadd.xlane.f32.xlu1 %v277_v16  ;;  %213 = vst.msk [vmem:[#allocation2 + $0x58] sm:$0xff] %vm201_vm0, %v1184_v48  ;;  %v252_v51 = vld [vmem:[#allocation2 + $0x1] sm:$0xff]  ;;  %v253_v60 = vld [vmem:[#allocation2 + $0x9] sm:$0xff] }
  0x31   : > { %272 = vadd.xlane.f32.xlu0 %v271_v17  ;;  %214 = vst.msk [vmem:[#allocation2 + $0x60] sm:$0xff] %vm201_vm0, %v1184_v48  ;;  %v254_v50 = vld [vmem:[#allocation2 + $0x11] sm:$0xff]  ;;  %v255_v59 = vld [vmem:[#allocation2 + $0x19] sm:$0xff]  ;;  %v1367_v17 = vstv %s926_s22 }
  0x32   : > { %215 = vst.msk [vmem:[#allocation2 + $0x68] sm:$0xff] %vm201_vm0, %v1184_v48  ;;  %v257_v58 = vld [vmem:[#allocation2 + $0x29] sm:$0xff] }
  0x33   : > { %216 = vst.msk [vmem:[#allocation2 + $0x70] sm:$0xff] %vm201_vm0, %v1184_v48  ;;  %v258_v6 = vld [vmem:[#allocation2 + $0x31] sm:$0xff] }
  0x34   : > { %217 = vst.msk [vmem:[#allocation2 + $0x78] sm:$0xff] %vm201_vm0, %v1184_v48  ;;  %v259_v5 = vld [vmem:[#allocation2 + $0x39] sm:$0xff] }
  0x35   : > { %v260_v3 = vld [vmem:[#allocation2 + $0x41] sm:$0xff]  ;;  %219 = vst.msk [vmem:[#allocation2 + $0x80] sm:$0x3] %vm218_vm1, %v1184_v48 }
  0x37   : > { %293 = vadd.xlane.f32.xlu2 %v292_v24 }
  0x38   : > { %290 = vadd.xlane.f32.xlu1 %v289_v25 }
  0x39   : > { %287 = vadd.xlane.f32.xlu0 %v286_v26 }
  0x3f   : > { %302 = vadd.xlane.f32.xlu2 %v301_v33 }
  0x40   : > { %299 = vadd.xlane.f32.xlu1 %v298_v34 }
  0x41   : > { %296 = vadd.xlane.f32.xlu0 %v295_v35 }
  0x47   : > { %311 = vadd.xlane.f32.xlu2 %v310_v42 }
  0x48   : > { %308 = vadd.xlane.f32.xlu1 %v307_v43 }
  0x49   : > { %305 = vadd.xlane.f32.xlu0 %v304_v44 }
  0x51   : > { %314 = vadd.xlane.f32.xlu0 %v313_v47 }
  0x9a   : > { %v282_v52 = vpop.xlane.xlu2 %281 }
  0x9b   : > { %v320_v53 = vadd.f32 %v282_v52, %v256_v49  ;;  %v276_v54 = vpop.xlane.xlu1 %275 }
  0x9c   : > { %v270_v55 = vpop.xlane.xlu0 %269  ;;  %v318_v56 = vadd.f32 %v276_v54, %v254_v50 }
  0x9d   : > { %v316_v57 = vadd.f32 %v270_v55, %v252_v51  ;;  %337 = vst.msk [vmem:[#allocation2 + $0x21] sm:$0xff] %vm201_vm0, %v320_v53  ;;  %v262_v55 = vld [vmem:[#allocation2 + $0x51] sm:$0xff] }
  0x9e   : > { %335 = vst.msk [vmem:[#allocation2 + $0x11] sm:$0xff] %vm201_vm0, %v318_v56  ;;  %v261_v56 = vld [vmem:[#allocation2 + $0x49] sm:$0xff] }
  0x9f   : > { %333 = vst.msk [vmem:[#allocation2 + $0x1] sm:$0xff] %vm201_vm0, %v316_v57 }
  0xa2   : > { %v285_v61 = vpop.xlane.xlu2 %284 }
  0xa3   : > { %v321_v62 = vadd.f32 %v285_v61, %v257_v58  ;;  %v279_v63 = vpop.xlane.xlu1 %278  ;;  %v263_v58 = vld [vmem:[#allocation2 + $0x59] sm:$0xff] }
  0xa4   : > { %v273_v0 = vpop.xlane.xlu0 %272  ;;  %v319_v1 = vadd.f32 %v279_v63, %v255_v59  ;;  %v372_v4 = vld [vmem:[#allocation2 + $0x21] sm:$0xff] }
  0xa5   : > { %v317_v2 = vadd.f32 %v273_v0, %v253_v60  ;;  %338 = vst.msk [vmem:[#allocation2 + $0x29] sm:$0xff] %vm201_vm0, %v321_v62  ;;  %v370_v12 = vld [vmem:[#allocation2 + $0x11] sm:$0xff]  ;;  %v424_v16 = vmul.f32 %v1362_v7, %v372_v4 }
  0xa6   : > { %336 = vst.msk [vmem:[#allocation2 + $0x19] sm:$0xff] %vm201_vm0, %v319_v1  ;;  %v352_v9 = vld [vmem:[#allocation2] sm:$0xff]  ;;  %v422_v26 = vmul.f32 %v1362_v7, %v370_v12 }
  0xa7   : > { %334 = vst.msk [vmem:[#allocation2 + $0x9] sm:$0xff] %vm201_vm0, %v317_v2  ;;  %v368_v10 = vld [vmem:[#allocation2 + $0x1] sm:$0xff]  ;;  %v402_v21 = vmul.f32 %v1364_v8, %v352_v9 }
  0xa8   : > { %v420_v22 = vmul.f32 %v1362_v7, %v368_v10 }
  0xaa   : > { %v294_v11 = vpop.xlane.xlu2 %293  ;;  %v436_v46 = vadd.f32 %v420_v22, %v402_v21 }
  0xab   : > { %v291_v13 = vpop.xlane.xlu1 %290  ;;  %v324_v15 = vadd.f32 %v294_v11, %v260_v3 }
  0xac   : > { %v288_v14 = vpop.xlane.xlu0 %287  ;;  %v388_v18 = vld [vmem:[#allocation2 + $0x22] sm:$0xff]  ;;  %v323_v19 = vadd.f32 %v291_v13, %v259_v5 }
  0xad   : > { %v322_v20 = vadd.f32 %v288_v14, %v258_v6  ;;  %v355_v23 = vld [vmem:[#allocation2 + $0x18] sm:$0xff]  ;;  %v356_v24 = vld [vmem:[#allocation2 + $0x20] sm:$0xff]  ;;  %341 = vst.msk [vmem:[#allocation2 + $0x41] sm:$0xff] %vm201_vm0, %v324_v15  ;;  %v458_v33 = vmul.f32 %v1367_v17, %v388_v18  ;;  %v357_v39 = vld [vmem:[#allocation2 + $0x28] sm:$0xff] }
  0xae   : > { %v371_v25 = vld [vmem:[#allocation2 + $0x19] sm:$0xff]  ;;  %v405_v29 = vmul.f32 %v1364_v8, %v355_v23  ;;  %v406_v30 = vmul.f32 %v1364_v8, %v356_v24  ;;  %v353_v32 = vld [vmem:[#allocation2 + $0x8] sm:$0xff]  ;;  %340 = vst.msk [vmem:[#allocation2 + $0x39] sm:$0xff] %vm201_vm0, %v323_v19  ;;  %v354_v35 = vld [vmem:[#allocation2 + $0x10] sm:$0xff]  ;;  %v407_v59 = vmul.f32 %v1364_v8, %v357_v39 }
  0xaf   : > { %v386_v27 = vld [vmem:[#allocation2 + $0x12] sm:$0xff]  ;;  %v387_v28 = vld [vmem:[#allocation2 + $0x1a] sm:$0xff]  ;;  %v423_v31 = vmul.f32 %v1362_v7, %v371_v25  ;;  %v369_v36 = vld [vmem:[#allocation2 + $0x9] sm:$0xff]  ;;  %v403_v38 = vmul.f32 %v1364_v8, %v353_v32  ;;  %339 = vst.msk [vmem:[#allocation2 + $0x31] sm:$0xff] %vm201_vm0, %v322_v20  ;;  %v404_v44 = vmul.f32 %v1364_v8, %v354_v35 }
  0xb0   : > { %v457_v34 = vmul.f32 %v1367_v17, %v387_v28  ;;  %v384_v37 = vld [vmem:[#allocation2 + $0x2] sm:$0xff]  ;;  %v440_v42 = vadd.f32 %v424_v16, %v406_v30  ;;  %v385_v43 = vld [vmem:[#allocation2 + $0xa] sm:$0xff]  ;;  %v421_v45 = vmul.f32 %v1362_v7, %v369_v36  ;;  %v456_v47 = vmul.f32 %v1367_v17, %v386_v27 }
  0xb1   : > { %v373_v40 = vld [vmem:[#allocation2 + $0x29] sm:$0xff]  ;;  %v439_v41 = vadd.f32 %v423_v31, %v405_v29  ;;  %v454_v49 = vmul.f32 %v1367_v17, %v384_v37  ;;  %v455_v50 = vmul.f32 %v1367_v17, %v385_v43  ;;  %v438_v54 = vadd.f32 %v422_v26, %v404_v44  ;;  %v264_v32 = vld [vmem:[#allocation2 + $0x61] sm:$0xff]  ;;  %v266_v43 = vld [vmem:[#allocation2 + $0x71] sm:$0xff] }
  0xb2   : > { %v474_v52 = vadd.f32 %v458_v33, %v440_v42  ;;  %v437_v53 = vadd.f32 %v421_v45, %v403_v38  ;;  %v303_v57 = vpop.xlane.xlu2 %302  ;;  %v425_v60 = vmul.f32 %v1362_v7, %v373_v40  ;;  %v265_v31 = vld [vmem:[#allocation2 + $0x69] sm:$0xff] }
  0xb3   : > { %v473_v51 = vadd.f32 %v457_v34, %v439_v41  ;;  %v470_v61 = vadd.f32 %v454_v49, %v436_v46  ;;  %v300_v62 = vpop.xlane.xlu1 %299  ;;  %v327_v0 = vadd.f32 %v303_v57, %v263_v58  ;;  %v472_v4 = vadd.f32 %v456_v47, %v438_v54 }
  0xb4   : > { %v297_v63 = vpop.xlane.xlu0 %296  ;;  %v931_v2 = vmul.f32 -0.00390625, %v474_v52  ;;  %v471_v3 = vadd.f32 %v455_v50, %v437_v53  ;;  %v326_v9 = vadd.f32 %v300_v62, %v262_v55  ;;  %v441_v15 = vadd.f32 %v425_v60, %v407_v59  ;;  %v376_v38 = vld [vmem:[#allocation2 + $0x41] sm:$0xff] }
  0xb5   : > { %v930_v1 = vmul.f32 -0.00390625, %v473_v51  ;;  %v927_v5 = vmul.f32 -0.00390625, %v470_v61  ;;  %v375_v6 = vld [vmem:[#allocation2 + $0x39] sm:$0xff]  ;;  %v325_v10 = vadd.f32 %v297_v63, %v261_v56  ;;  %344 = vst.msk [vmem:[#allocation2 + $0x59] sm:$0xff] %vm201_vm0, %v327_v0  ;;  %v929_v14 = vmul.f32 -0.00390625, %v472_v4 }
  0xb6   : > { %v526_v12 = vmul.f32 1.442695, %v931_v2  ;;  %v928_v13 = vmul.f32 -0.00390625, %v471_v3  ;;  %v427_v18 = vmul.f32 %v1362_v7, %v375_v6  ;;  %v358_v19 = vld [vmem:[#allocation2 + $0x30] sm:$0xff]  ;;  %v359_v20 = vld [vmem:[#allocation2 + $0x38] sm:$0xff]  ;;  %343 = vst.msk [vmem:[#allocation2 + $0x51] sm:$0xff] %vm201_vm0, %v326_v9  ;;  %v428_v54 = vmul.f32 %v1362_v7, %v376_v38 }
  0xb7   : > { %v524_v11 = vmul.f32 1.442695, %v930_v1  ;;  %v518_v16 = vmul.f32 1.442695, %v927_v5  ;;  %v374_v21 = vld [vmem:[#allocation2 + $0x31] sm:$0xff]  ;;  %v408_v25 = vmul.f32 %v1364_v8, %v358_v19  ;;  %v409_v26 = vmul.f32 %v1364_v8, %v359_v20  ;;  %v391_v29 = vld [vmem:[#allocation2 + $0x3a] sm:$0xff] }
  0xb8   : > { %v520_v22 = vmul.f32 1.442695, %v928_v13  ;;  %v522_v23 = vmul.f32 1.442695, %v929_v14  ;;  %v389_v24 = vld [vmem:[#allocation2 + $0x2a] sm:$0xff]  ;;  %v426_v27 = vmul.f32 %v1362_v7, %v374_v21  ;;  %342 = vst.msk [vmem:[#allocation2 + $0x49] sm:$0xff] %vm201_vm0, %v325_v10  ;;  %v461_v39 = vmul.f32 %v1367_v17, %v391_v29 }
  0xb9   : > { %1016 = vpow2.f32 %v524_v11  ;;  %v459_v28 = vmul.f32 %v1367_v17, %v389_v24  ;;  %v390_v30 = vld [vmem:[#allocation2 + $0x32] sm:$0xff]  ;;  %v360_v37 = vld [vmem:[#allocation2 + $0x40] sm:$0xff]  ;;  %v443_v44 = vadd.f32 %v427_v18, %v409_v26 }
  0xba   : > { %1018 = vpow2.f32 %v526_v12  ;;  %v442_v33 = vadd.f32 %v426_v27, %v408_v25  ;;  %v312_v42 = vpop.xlane.xlu2 %311  ;;  %v460_v45 = vmul.f32 %v1367_v17, %v390_v30  ;;  %v410_v53 = vmul.f32 %v1364_v8, %v360_v37 }
  0xbb   : > { %1020 = vpow2.f32 %v518_v16  ;;  %v475_v34 = vadd.f32 %v459_v28, %v441_v15  ;;  %v309_v35 = vpop.xlane.xlu1 %308  ;;  %v330_v47 = vadd.f32 %v312_v42, %v266_v43  ;;  %v477_v59 = vadd.f32 %v461_v39, %v443_v44 }
  0xbc   : > { %1022 = vpow2.f32 %v520_v22  ;;  %v306_v36 = vpop.xlane.xlu0 %305  ;;  %v329_v40 = vadd.f32 %v309_v35, %v265_v31  ;;  %v476_v52 = vadd.f32 %v460_v45, %v442_v33  ;;  %v1414_v0 = vadd.f32 %v428_v54, %v410_v53 }
  0xbd   : > { %1024 = vpow2.f32 %v522_v23  ;;  %v328_v41 = vadd.f32 %v306_v36, %v264_v32  ;;  %v932_v46 = vmul.f32 -0.00390625, %v475_v34  ;;  %347 = vst.msk [vmem:[#allocation2 + $0x71] sm:$0xff] %vm201_vm0, %v330_v47  ;;  %v378_v1 = vld [vmem:[#allocation2 + $0x51] sm:$0xff]  ;;  %v934_v9 = vmul.f32 -0.00390625, %v477_v59 }
  0xbe   : > { %346 = vst.msk [vmem:[#allocation2 + $0x69] sm:$0xff] %vm201_vm0, %v329_v40  ;;  %v933_v63 = vmul.f32 -0.00390625, %v476_v52  ;;  %v394_v2 = vld [vmem:[#allocation2 + $0x52] sm:$0xff]  ;;  %v1427_v11 = vmul.f32 %v1362_v7, %v378_v1 }
  0xbf   : > { %v1017_v49 = vpop.eup %1016  ;;  %345 = vst.msk [vmem:[#allocation2 + $0x61] sm:$0xff] %vm201_vm0, %v328_v41  ;;  %v528_v57 = vmul.f32 1.442695, %v932_v46  ;;  %v1430_v12 = vmul.f32 %v1367_v17, %v394_v2  ;;  %v361_v37 = vld [vmem:[#allocation2 + $0x48] sm:$0xff] }
  0xc0   : > { %v1019_v50 = vpop.eup %1018  ;;  %v1399_v51 = vadd.f32 1.0, %v1017_v49  ;;  %v530_v28 = vmul.f32 1.442695, %v933_v63  ;;  %v411_v52 = vmul.f32 %v1364_v8, %v361_v37  ;;  %v393_v18 = vld [vmem:[#allocation2 + $0x4a] sm:$0xff] }
  0xc1   : > { %v1021_v55 = vpop.eup %1020  ;;  %v1404_v56 = vadd.f32 1.0, %v1019_v50  ;;  %v532_v50 = vmul.f32 1.442695, %v934_v9 }
  0xc2   : > { %v1023_v58 = vpop.eup %1022  ;;  %1026 = vrcp.f32 %v1399_v51  ;;  %v1410_v61 = vadd.f32 1.0, %v1021_v55  ;;  %v620_v3 = vand.u32 2147483647, %v1399_v51  ;;  %v622_v4 = vand.u32 2147483648, %v1399_v51 }
  0xc3   : > { %v1025_v60 = vpop.eup %1024  ;;  %1028 = vrcp.f32 %v1404_v56  ;;  %v1412_v62 = vadd.f32 1.0, %v1023_v58  ;;  %v635_v6 = vand.u32 2147483647, %v1404_v56  ;;  %v637_v48 = vand.u32 2147483648, %v1404_v56 }
  0xc4   : > { %v1418_v5 = vadd.f32 1.0, %v1025_v60  ;;  %1030 = vpow2.f32 %v528_v57  ;;  %v577_v10 = vand.u32 2147483648, %v1410_v61  ;;  %vm616_vm2 = vweird.f32 %v1399_v51  ;;  %v362_v57 = vld [vmem:[#allocation2 + $0x50] sm:$0xff] }
  0xc5   : > { %1032 = vrcp.f32 %v1410_v61  ;;  %vm631_vm3 = vweird.f32 %v1404_v56  ;;  %v592_v14 = vand.u32 2147483648, %v1412_v62  ;;  %vm1437_vm4 = vcmp.eq.f32.partialorder %v620_v3, 8.507059e+37 }
  0xc6   : > { %1034 = vrcp.f32 %v1412_v62  ;;  %v623_v19 = vor.u32 1.1754944e-38, %v622_v4  ;;  %v575_v20 = vand.u32 2147483647, %v1410_v61  ;;  %vm1443_vm5 = vcmp.eq.f32.partialorder %v635_v6, 8.507059e+37 }
  0xc7   : > { %1036 = vrcp.f32 %v1418_v5  ;;  %v638_v23 = vor.u32 1.1754944e-38, %v637_v48  ;;  %v590_v24 = vand.u32 2147483647, %v1412_v62  ;;  %vm571_vm6 = vweird.f32 %v1410_v61 }
  0xc8   : > { %v1027_v13 = vpop.eup %1026  ;;  %v1454_v27 = vor.u32 1.1754944e-38, %v577_v10  ;;  %vm586_vm8 = vweird.f32 %v1412_v62  ;;  %v1457_v31 = vor.u32 1.1754944e-38, %v592_v14  ;;  %vm1464_vm10 = vcmp.eq.f32.partialorder %v575_v20, 8.507059e+37 }
  0xc9   : > { %v1029_v15 = vpop.eup %1028  ;;  %v612_v16 = vmul.f32 %v1027_v13, %v1399_v51  ;;  %vm617_vm7 = vweird.f32 %v1027_v13  ;;  %vm601_vm11 = vweird.f32 %v1418_v5  ;;  %1038 = vpow2.f32 %v530_v28 }
  0xca   : > { %v627_v21 = vmul.f32 %v1029_v15, %v1404_v56  ;;  %v1031_v25 = vpop.eup %1030  ;;  %vm632_vm9 = vweird.f32 %v1029_v15  ;;  %vm1471_vm12 = vcmp.eq.f32.partialorder %v590_v24, 8.507059e+37  ;;  %v605_v42 = vand.u32 2147483647, %v1418_v5  ;;  %vm618_vm13 = vmor %vm616_vm2, %vm617_vm7  ;;  %v379_v24 = vld [vmem:[#allocation2 + $0x59] sm:$0xff] }
  0xcb   : > { %v613_v26 = vsub.f32 1.0, %v612_v16  ;;  %v1033_v29 = vpop.eup %1032  ;;  %v1459_v32 = vadd.f32 1.0, %v1031_v25  ;;  %v607_v46 = vand.u32 2147483648, %v1418_v5  ;;  %vm633_vm14 = vmor %vm631_vm3, %vm632_vm9  ;;  %v412_v6 = vmul.f32 %v1364_v8, %v362_v57  ;;  %v392_v16 = vld [vmem:[#allocation2 + $0x42] sm:$0xff]  ;;  %v395_v57 = vld [vmem:[#allocation2 + $0x5a] sm:$0xff] }
  0xcc   : > { %v628_v30 = vsub.f32 1.0, %v627_v21  ;;  %v1461_v33 = vpop.eup %1034  ;;  %v567_v35 = vmul.f32 %v1033_v29, %v1410_v61  ;;  %vm572_vm15 = vweird.f32 %v1033_v29 }
  0xcd   : > { %v614_v34 = vmul.f32 %v1027_v13, %v613_v26  ;;  %v1037_v38 = vpop.eup %1036  ;;  %v582_v40 = vmul.f32 %v1461_v33, %v1412_v62  ;;  %1040 = vrcp.f32 %v1459_v32  ;;  %vm587_vm1 = vweird.f32 %v1461_v33  ;;  %vm573_vm3 = vmor %vm571_vm6, %vm572_vm15 }
  0xce   : > { %v629_v39 = vmul.f32 %v1029_v15, %v628_v30  ;;  %v568_v44 = vsub.f32 1.0, %v567_v35  ;;  %v597_v45 = vmul.f32 %v1037_v38, %v1418_v5  ;;  %vm602_vm2 = vweird.f32 %v1037_v38 }
  0xcf   : > { %v615_v43 = vadd.f32 %v1027_v13, %v614_v34  ;;  %v583_v49 = vsub.f32 1.0, %v582_v40  ;;  %v1039_v56 = vpop.eup %1038  ;;  %1042 = vpow2.f32 %v532_v50  ;;  %vm603_vm6 = vmor %vm601_vm11, %vm602_vm2  ;;  %v608_v62 = vor.u32 1.1754944e-38, %v607_v46  ;;  %v365_v46 = vld [vmem:[#allocation2 + $0x68] sm:$0xff] }
  0xd0   : > { %v630_v47 = vadd.f32 %v1029_v15, %v629_v39  ;;  %v569_v54 = vmul.f32 %v1033_v29, %v568_v44  ;;  %v598_v55 = vsub.f32 1.0, %v597_v45  ;;  %v1506_v4 = vadd.f32 1.0, %v1039_v56  ;;  %v364_v39 = vld [vmem:[#allocation2 + $0x60] sm:$0xff]  ;;  %v381_v45 = vld [vmem:[#allocation2 + $0x69] sm:$0xff] }
  0xd1   : > { %v619_v53 = vsel %vm618_vm13, %v1027_v13, %v615_v43  ;;  %v584_v59 = vmul.f32 %v1461_v33, %v583_v49  ;;  %v377_v13 = vld [vmem:[#allocation2 + $0x49] sm:$0xff]  ;;  %v650_v22 = vand.u32 2147483647, %v1459_v32  ;;  %v652_v25 = vand.u32 2147483648, %v1459_v32 }
  0xd2   : > { %v624_v51 = vsel %vm1437_vm4, %v623_v19, %v619_v53  ;;  %v634_v58 = vsel %vm633_vm14, %v1029_v15, %v630_v47  ;;  %v570_v63 = vadd.f32 %v1033_v29, %v569_v54  ;;  %v599_v1 = vmul.f32 %v1037_v38, %v598_v55  ;;  %vm588_vm4 = vmor %vm586_vm8, %vm587_vm1  ;;  %v380_v47 = vld [vmem:[#allocation2 + $0x61] sm:$0xff] }
  0xd3   : > { %v639_v60 = vsel %vm1443_vm5, %v638_v23, %v634_v58  ;;  %809 = vst.msk [vmem:[%s1490_s27 + $0x18] sm:$0xff] %vm201_vm0, %v624_v51  ;;  %v1041_v2 = vpop.eup %1040  ;;  %v585_v3 = vadd.f32 %v1461_v33, %v584_v59  ;;  %vm1513_vm5 = vcmp.eq.f32.partialorder %v605_v42, 8.507059e+37  ;;  %1044 = vrcp.f32 %v1506_v4  ;;  %v363_v23 = vld [vmem:[#allocation2 + $0x58] sm:$0xff]  ;;  %v396_v58 = vld [vmem:[#allocation2 + $0x62] sm:$0xff] }
  0xd4   : > { %810 = vst.msk [vmem:[%s1490_s27 + $0x20] sm:$0xff] %vm201_vm0, %v639_v60  ;;  %v574_v48 = vsel %vm573_vm3, %v1033_v29, %v570_v63  ;;  %v600_v9 = vadd.f32 %v1037_v38, %v599_v1  ;;  %v642_v61 = vmul.f32 %v1041_v2, %v1459_v32  ;;  %v429_v26 = vmul.f32 %v1362_v7, %v377_v13  ;;  %v397_v13 = vld [vmem:[#allocation2 + $0x6a] sm:$0xff] }
  0xd5   : > { %v579_v14 = vsel %vm1464_vm10, %v1454_v27, %v574_v48  ;;  %v589_v15 = vsel %vm588_vm4, %v1461_v33, %v585_v3  ;;  %v446_v27 = vadd.f32 %v1427_v11, %v412_v6  ;;  %vm646_vm7 = vweird.f32 %v1459_v32  ;;  %v1043_v30 = vpop.eup %1042 }
  0xd6   : > { %v594_v19 = vsel %vm1471_vm12, %v1457_v31, %v589_v15  ;;  %v604_v20 = vsel %vm603_vm6, %v1037_v38, %v600_v9  ;;  %806 = vst.msk [vmem:[%s1490_s27] sm:$0xff] %vm201_vm0, %v579_v14  ;;  %v643_v21 = vsub.f32 1.0, %v642_v61  ;;  %vm647_vm8 = vweird.f32 %v1041_v2 }
  0xd7   : > { %v609_v5 = vsel %vm1513_vm5, %v608_v62, %v604_v20  ;;  %807 = vst.msk [vmem:[%s1490_s27 + $0x8] sm:$0xff] %vm201_vm0, %v594_v19  ;;  %v462_v29 = vmul.f32 %v1367_v17, %v392_v16  ;;  %v445_v31 = vadd.f32 %v429_v26, %v411_v52  ;;  %v463_v33 = vmul.f32 %v1367_v17, %v393_v18  ;;  %vm648_vm9 = vmor %vm646_vm7, %vm647_vm8  ;;  %v315_v16 = vpop.xlane.xlu0 %314 }
  0xd8   : > { %808 = vst.msk [vmem:[%s1490_s27 + $0x10] sm:$0xff] %vm201_vm0, %v609_v5  ;;  %v644_v28 = vmul.f32 %v1041_v2, %v643_v21  ;;  %v413_v34 = vmul.f32 %v1364_v8, %v363_v23  ;;  %v431_v35 = vmul.f32 %v1362_v7, %v379_v24  ;;  %v1546_v37 = vadd.f32 1.0, %v1043_v30 }
  0xd9   : > { %v478_v11 = vadd.f32 %v462_v29, %v1414_v0  ;;  %v480_v38 = vadd.f32 %v1430_v12, %v446_v27  ;;  %v1045_v32 = vpop.eup %1044  ;;  %vm651_vm10 = vcmp.eq.f32.partialorder %v650_v22, 8.507059e+37  ;;  %v653_v40 = vor.u32 1.1754944e-38, %v652_v25 }
  0xda   : > { %v645_v36 = vadd.f32 %v1041_v2, %v644_v28  ;;  %v479_v41 = vadd.f32 %v463_v33, %v445_v31  ;;  %v657_v43 = vmul.f32 %v1045_v32, %v1506_v4  ;;  %v665_v44 = vand.u32 2147483647, %v1506_v4 }
  0xdb   : > { %1046 = vrcp.f32 %v1546_v37  ;;  %v667_v12 = vand.u32 2147483648, %v1506_v4  ;;  %v447_v49 = vadd.f32 %v431_v35, %v413_v34  ;;  %v414_v50 = vmul.f32 %v1364_v8, %v364_v39  ;;  %v366_v39 = vld [vmem:[#allocation2 + $0x70] sm:$0xff] }
  0xdc   : > { %v649_v42 = vsel %vm648_vm9, %v1041_v2, %v645_v36  ;;  %v658_v52 = vsub.f32 1.0, %v657_v43  ;;  %v935_v53 = vmul.f32 -0.00390625, %v478_v11  ;;  %v936_v54 = vmul.f32 -0.00390625, %v479_v41 }
  0xdd   : > { %v654_v0 = vsel %vm651_vm10, %v653_v40, %v649_v42  ;;  %v937_v55 = vmul.f32 -0.00390625, %v480_v38  ;;  %vm662_vm11 = vweird.f32 %v1045_v32  ;;  %v433_v51 = vmul.f32 %v1362_v7, %v381_v45 }
  0xde   : > { %811 = vst.msk [vmem:[%s1490_s27 + $0x28] sm:$0xff] %vm201_vm0, %v654_v0  ;;  %v415_v59 = vmul.f32 %v1364_v8, %v365_v46  ;;  %v432_v56 = vmul.f32 %v1362_v7, %v380_v47  ;;  %v659_v60 = vmul.f32 %v1045_v32, %v658_v52  ;;  %v534_v63 = vmul.f32 1.442695, %v935_v53 }
  0xdf   : > { %v536_v1 = vmul.f32 1.442695, %v936_v54  ;;  %v538_v2 = vmul.f32 1.442695, %v937_v55  ;;  %vm661_vm12 = vweird.f32 %v1506_v4  ;;  %v465_v6 = vmul.f32 %v1367_v17, %v395_v57  ;;  %v267_v4 = vld [vmem:[#allocation2 + $0x79] sm:$0xff] }
  0xe0   : > { %v448_v3 = vadd.f32 %v432_v56, %v414_v50  ;;  %v660_v9 = vadd.f32 %v1045_v32, %v659_v60  ;;  %v668_v10 = vor.u32 1.1754944e-38, %v667_v12  ;;  %1048 = vpow2.f32 %v534_v63  ;;  %vm663_vm13 = vmor %vm661_vm12, %vm662_vm11 }
  0xe1   : > { %v1047_v48 = vpop.eup %1046  ;;  %v466_v61 = vmul.f32 %v1367_v17, %v396_v58  ;;  %1050 = vpow2.f32 %v536_v1  ;;  %v449_v15 = vadd.f32 %v433_v51, %v415_v59  ;;  %v481_v62 = vadd.f32 %v465_v6, %v447_v49 }
  0xe2   : > { %v672_v14 = vmul.f32 %v1047_v48, %v1546_v37  ;;  %v664_v18 = vsel %vm663_vm13, %v1045_v32, %v660_v9  ;;  %vm666_vm14 = vcmp.eq.f32.partialorder %v665_v44, 8.507059e+37  ;;  %1052 = vpow2.f32 %v538_v2  ;;  %v382_v32 = vld [vmem:[#allocation2 + $0x71] sm:$0xff] }
  0xe3   : > { %v482_v19 = vadd.f32 %v466_v61, %v448_v3  ;;  %v669_v20 = vsel %vm666_vm14, %v668_v10, %v664_v18  ;;  %v938_v22 = vmul.f32 -0.00390625, %v481_v62  ;;  %v467_v23 = vmul.f32 %v1367_v17, %v397_v13 }
  0xe4   : > { %v673_v21 = vsub.f32 1.0, %v672_v14  ;;  %812 = vst.msk [vmem:[%s1490_s27 + $0x30] sm:$0xff] %vm201_vm0, %v669_v20  ;;  %v680_v24 = vand.u32 2147483647, %v1546_v37  ;;  %v682_v5 = vand.u32 2147483648, %v1546_v37  ;;  %v331_v26 = vadd.f32 %v315_v16, %v267_v4 }
  0xe5   : > { %v939_v25 = vmul.f32 -0.00390625, %v482_v19  ;;  %vm677_vm15 = vweird.f32 %v1047_v48  ;;  %v540_v28 = vmul.f32 1.442695, %v938_v22  ;;  %v483_v29 = vadd.f32 %v467_v23, %v449_v15 }
  0xe6   : > { %v674_v27 = vmul.f32 %v1047_v48, %v673_v21  ;;  %v1049_v30 = vpop.eup %1048  ;;  %348 = vst.msk [vmem:[#allocation2 + $0x79] sm:$0xff] %vm201_vm0, %v331_v26  ;;  %vm676_vm1 = vweird.f32 %v1546_v37  ;;  %v683_v11 = vor.u32 1.1754944e-38, %v682_v5  ;;  %vm681_vm3 = vcmp.eq.f32.partialorder %v680_v24, 8.507059e+37 }
  0xe7   : > { %v542_v31 = vmul.f32 1.442695, %v939_v25  ;;  %v1051_v33 = vpop.eup %1050  ;;  %v1572_v35 = vadd.f32 1.0, %v1049_v30  ;;  %1054 = vpow2.f32 %v540_v28  ;;  %vm678_vm2 = vmor %vm676_vm1, %vm677_vm15  ;;  %v940_v40 = vmul.f32 -0.00390625, %v483_v29 }
  0xe8   : > { %v675_v34 = vadd.f32 %v1047_v48, %v674_v27  ;;  %v1053_v36 = vpop.eup %1052  ;;  %v1574_v38 = vadd.f32 1.0, %v1051_v33  ;;  %v416_v43 = vmul.f32 %v1364_v8, %v366_v39  ;;  %v434_v44 = vmul.f32 %v1362_v7, %v382_v32 }
  0xe9   : > { %1056 = vpow2.f32 %v542_v31  ;;  %v1580_v37 = vadd.f32 1.0, %v1053_v36  ;;  %v695_v45 = vand.u32 2147483647, %v1572_v35  ;;  %v544_v46 = vmul.f32 1.442695, %v940_v40 }
  0xea   : > { %v679_v41 = vsel %vm678_vm2, %v1047_v48, %v675_v34  ;;  %1058 = vrcp.f32 %v1572_v35  ;;  %v697_v0 = vand.u32 2147483648, %v1572_v35  ;;  %v710_v49 = vand.u32 2147483647, %v1574_v38 }
  0xeb   : > { %v684_v42 = vsel %vm681_vm3, %v683_v11, %v679_v41  ;;  %1060 = vrcp.f32 %v1574_v38  ;;  %v712_v53 = vand.u32 2147483648, %v1574_v38  ;;  %v450_v55 = vadd.f32 %v434_v44, %v416_v43 }
  0xec   : > { %813 = vst.msk [vmem:[%s1490_s27 + $0x38] sm:$0xff] %vm201_vm0, %v684_v42  ;;  %1062 = vrcp.f32 %v1580_v37  ;;  %vm691_vm4 = vweird.f32 %v1572_v35  ;;  %vm1595_vm5 = vcmp.eq.f32.partialorder %v695_v45, 8.507059e+37  ;;  %vm706_vm6 = vweird.f32 %v1574_v38 }
  0xed   : > { %v1055_v47 = vpop.eup %1054  ;;  %1064 = vpow2.f32 %v544_v46  ;;  %v367_v59 = vld [vmem:[#allocation2 + $0x78] sm:$0xff]  ;;  %v698_v60 = vor.u32 1.1754944e-38, %v697_v0  ;;  %v725_v1 = vand.u32 2147483647, %v1580_v37  ;;  %vm1603_vm7 = vcmp.eq.f32.partialorder %v710_v49, 8.507059e+37 }
  0xee   : > { %v1588_v50 = vadd.f32 1.0, %v1055_v47  ;;  %v383_v56 = vld [vmem:[#allocation2 + $0x79] sm:$0xff]  ;;  %v727_v48 = vand.u32 2147483648, %v1580_v37  ;;  %v713_v61 = vor.u32 1.1754944e-38, %v712_v53  ;;  %v417_v13 = vmul.f32 %v1364_v8, %v367_v59 }
  0xef   : > { %v1057_v12 = vpop.eup %1056  ;;  %v398_v2 = vld [vmem:[#allocation2 + $0x72] sm:$0xff]  ;;  %v435_v14 = vmul.f32 %v1362_v7, %v383_v56  ;;  %vm721_vm10 = vweird.f32 %v1580_v37  ;;  %vm1614_vm11 = vcmp.eq.f32.partialorder %v725_v1, 8.507059e+37  ;;  %v399_v7 = vld [vmem:[#allocation2 + $0x7a] sm:$0xff] }
  0xf0   : > { %v1059_v52 = vpop.eup %1058  ;;  %v1591_v54 = vadd.f32 1.0, %v1057_v12  ;;  %1066 = vrcp.f32 %v1588_v50  ;;  %v468_v4 = vmul.f32 %v1367_v17, %v398_v2  ;;  %v728_v8 = vor.u32 1.1754944e-38, %v727_v48 }
  0xf1   : > { %v1061_v57 = vpop.eup %1060  ;;  %v687_v51 = vmul.f32 %v1059_v52, %v1572_v35  ;;  %vm692_vm8 = vweird.f32 %v1059_v52  ;;  %v740_v5 = vand.u32 2147483647, %v1588_v50  ;;  %v451_v25 = vadd.f32 %v435_v14, %v417_v13 }
  0xf2   : > { %v702_v63 = vmul.f32 %v1061_v57, %v1574_v38  ;;  %1068 = vrcp.f32 %v1591_v54  ;;  %v1063_v9 = vpop.eup %1062  ;;  %vm707_vm9 = vweird.f32 %v1061_v57  ;;  %vm693_vm12 = vmor %vm691_vm4, %vm692_vm8  ;;  %v484_v30 = vadd.f32 %v468_v4, %v450_v55 }
  0xf3   : > { %v688_v3 = vsub.f32 1.0, %v687_v51  ;;  %v1065_v15 = vpop.eup %1064  ;;  %v717_v16 = vmul.f32 %v1063_v9, %v1580_v37  ;;  %vm722_vm13 = vweird.f32 %v1063_v9  ;;  %vm708_vm14 = vmor %vm706_vm6, %vm707_vm9  ;;  %v469_v35 = vmul.f32 %v1367_v17, %v399_v7 }
  0xf4   : > { %v703_v10 = vsub.f32 1.0, %v702_v63  ;;  %v1618_v22 = vadd.f32 1.0, %v1065_v15  ;;  %vm723_vm15 = vmor %vm721_vm10, %vm722_vm13  ;;  %v742_v39 = vand.u32 2147483648, %v1588_v50  ;;  %v757_v32 = vand.u32 2147483648, %v1591_v54 }
  0xf5   : > { %v689_v62 = vmul.f32 %v1059_v52, %v688_v3  ;;  %v718_v21 = vsub.f32 1.0, %v717_v16  ;;  %v485_v42 = vadd.f32 %v469_v35, %v451_v25  ;;  %v941_v43 = vmul.f32 -0.00390625, %v484_v30 }
  0xf6   : > { %v704_v18 = vmul.f32 %v1061_v57, %v703_v10  ;;  %v1067_v23 = vpop.eup %1066  ;;  %1070 = vrcp.f32 %v1618_v22  ;;  %v755_v46 = vand.u32 2147483647, %v1591_v54  ;;  %vm736_vm3 = vweird.f32 %v1588_v50 }
  0xf7   : > { %v690_v20 = vadd.f32 %v1059_v52, %v689_v62  ;;  %v719_v28 = vmul.f32 %v1063_v9, %v718_v21  ;;  %v732_v29 = vmul.f32 %v1067_v23, %v1588_v50  ;;  %vm737_vm1 = vweird.f32 %v1067_v23 }
  0xf8   : > { %v705_v24 = vadd.f32 %v1061_v57, %v704_v18  ;;  %v1069_v26 = vpop.eup %1068  ;;  %v942_v47 = vmul.f32 -0.00390625, %v485_v42  ;;  %v546_v0 = vmul.f32 1.442695, %v941_v43  ;;  %vm738_vm4 = vmor %vm736_vm3, %vm737_vm1  ;;  %v743_v12 = vor.u32 1.1754944e-38, %v742_v39 }
  0xf9   : > { %v694_v27 = vsel %vm693_vm12, %v1059_v52, %v690_v20  ;;  %v747_v34 = vmul.f32 %v1069_v26, %v1591_v54  ;;  %v720_v11 = vadd.f32 %v1063_v9, %v719_v28  ;;  %v733_v38 = vsub.f32 1.0, %v732_v29 }
  0xfa   : > { %v699_v31 = vsel %vm1595_vm5, %v698_v60, %v694_v27  ;;  %v709_v33 = vsel %vm708_vm14, %v1061_v57, %v705_v24  ;;  %vm752_vm2 = vweird.f32 %v1069_v26  ;;  %vm741_vm5 = vcmp.eq.f32.partialorder %v740_v5, 8.507059e+37 }
  0xfb   : > { %v714_v36 = vsel %vm1603_vm7, %v713_v61, %v709_v33  ;;  %814 = vst.msk [vmem:[%s1490_s27 + $0x40] sm:$0xff] %vm201_vm0, %v699_v31  ;;  %v748_v17 = vsub.f32 1.0, %v747_v34  ;;  %v724_v40 = vsel %vm723_vm15, %v1063_v9, %v720_v11  ;;  %v734_v41 = vmul.f32 %v1067_v23, %v733_v38 }
  0xfc   : > { %815 = vst.msk [vmem:[%s1490_s27 + $0x48] sm:$0xff] %vm201_vm0, %v714_v36  ;;  %v729_v44 = vsel %vm1614_vm11, %v728_v8, %v724_v40  ;;  %vm751_vm6 = vweird.f32 %v1591_v54  ;;  %v1071_v52 = vpop.eup %1070  ;;  %v758_v55 = vor.u32 1.1754944e-38, %v757_v32  ;;  %1072 = vpow2.f32 %v546_v0 }
  0xfd   : > { %v749_v45 = vmul.f32 %v1069_v26, %v748_v17  ;;  %816 = vst.msk [vmem:[%s1490_s27 + $0x50] sm:$0xff] %vm201_vm0, %v729_v44  ;;  %v735_v37 = vadd.f32 %v1067_v23, %v734_v41  ;;  %vm753_vm7 = vmor %vm751_vm6, %vm752_vm2  ;;  %v548_v57 = vmul.f32 1.442695, %v942_v47  ;;  %vm756_vm8 = vcmp.eq.f32.partialorder %v755_v46, 8.507059e+37 }
  0xfe   : > { %v762_v50 = vmul.f32 %v1071_v52, %v1618_v22  ;;  %v772_v54 = vand.u32 2147483648, %v1618_v22  ;;  %vm767_vm9 = vweird.f32 %v1071_v52  ;;  %v770_v63 = vand.u32 2147483647, %v1618_v22 }
  0xff   : > { %v750_v49 = vadd.f32 %v1069_v26, %v749_v45  ;;  %v739_v53 = vsel %vm738_vm4, %v1067_v23, %v735_v37  ;;  %1074 = vpow2.f32 %v548_v57  ;;  %vm766_vm10 = vweird.f32 %v1618_v22 }
 0x100   : > { %v744_v51 = vsel %vm741_vm5, %v743_v12, %v739_v53  ;;  %v763_v56 = vsub.f32 1.0, %v762_v50  ;;  %vm768_vm11 = vmor %vm766_vm10, %vm767_vm9  ;;  %v773_v48 = vor.u32 1.1754944e-38, %v772_v54  ;;  %vm771_vm12 = vcmp.eq.f32.partialorder %v770_v63, 8.507059e+37 }
 0x101   : > { %v754_v58 = vsel %vm753_vm7, %v1069_v26, %v750_v49  ;;  %817 = vst.msk [vmem:[%s1490_s27 + $0x58] sm:$0xff] %vm201_vm0, %v744_v51 }
 0x102   : > { %v759_v59 = vsel %vm756_vm8, %v758_v55, %v754_v58  ;;  %v764_v60 = vmul.f32 %v1071_v52, %v763_v56  ;;  %v1073_v1 = vpop.eup %1072 }
 0x103   : > { %818 = vst.msk [vmem:[%s1490_s27 + $0x60] sm:$0xff] %vm201_vm0, %v759_v59  ;;  %v564_v3 = vadd.f32 1.0, %v1073_v1 }
 0x104   : > { %v765_v2 = vadd.f32 %v1071_v52, %v764_v60 }
 0x105   : > { %v1075_v6 = vpop.eup %1074  ;;  %1076 = vrcp.f32 %v564_v3  ;;  %v787_v4 = vand.u32 2147483648, %v564_v3  ;;  %v785_v19 = vand.u32 2147483647, %v564_v3  ;;  %vm781_vm14 = vweird.f32 %v564_v3 }
 0x106   : > { %v769_v9 = vsel %vm768_vm11, %v1071_v52, %v765_v2  ;;  %v565_v10 = vadd.f32 1.0, %v1075_v6 }
 0x107   : > { %v774_v61 = vsel %vm771_vm12, %v773_v48, %v769_v9  ;;  %v788_v23 = vor.u32 1.1754944e-38, %v787_v4  ;;  %vm786_vm2 = vcmp.eq.f32.partialorder %v785_v19, 8.507059e+37 }
 0x108   : > { %819 = vst.msk [vmem:[%s1490_s27 + $0x68] sm:$0xff] %vm201_vm0, %v774_v61  ;;  %1078 = vrcp.f32 %v565_v10  ;;  %v802_v21 = vand.u32 2147483648, %v565_v10  ;;  %v800_v7 = vand.u32 2147483647, %v565_v10  ;;  %vm796_vm3 = vweird.f32 %v565_v10 }
 0x10a   : > { %v803_v26 = vor.u32 1.1754944e-38, %v802_v21  ;;  %vm801_vm5 = vcmp.eq.f32.partialorder %v800_v7, 8.507059e+37 }
 0x10b   : > { %v1077_v13 = vpop.eup %1076 }
 0x10c   : > { %v777_v14 = vmul.f32 %v1077_v13, %v564_v3  ;;  %vm782_vm13 = vweird.f32 %v1077_v13 }
 0x10d   : > { %vm783_vm1 = vmor %vm781_vm14, %vm782_vm13 }
 0x10e   : > { %v1079_v15 = vpop.eup %1078  ;;  %v778_v62 = vsub.f32 1.0, %v777_v14 }
 0x10f   : > { %v792_v16 = vmul.f32 %v1079_v15, %v565_v10  ;;  %vm797_vm15 = vweird.f32 %v1079_v15 }
 0x110   : > { %v779_v18 = vmul.f32 %v1077_v13, %v778_v62  ;;  %vm798_vm4 = vmor %vm796_vm3, %vm797_vm15 }
 0x111   : > { %v793_v20 = vsub.f32 1.0, %v792_v16 }
 0x112   : > { %v780_v8 = vadd.f32 %v1077_v13, %v779_v18 }
 0x113   : > { %v794_v22 = vmul.f32 %v1079_v15, %v793_v20 }
 0x114   : > { %v784_v24 = vsel %vm783_vm1, %v1077_v13, %v780_v8 }
 0x115   : > { %v795_v5 = vadd.f32 %v1079_v15, %v794_v22  ;;  %v789_v25 = vsel %vm786_vm2, %v788_v23, %v784_v24 }
 0x116   : > { %820 = vst.msk [vmem:[%s1490_s27 + $0x70] sm:$0xff] %vm201_vm0, %v789_v25 }
 0x117   : > { %v799_v27 = vsel %vm798_vm4, %v1079_v15, %v795_v5 }
 0x118   : > { %v804_v28 = vsel %vm801_vm5, %v803_v26, %v799_v27 }
 0x119   : > { %821 = vst.msk [vmem:[%s1490_s27 + $0x78] sm:$0xff] %vm201_vm0, %v804_v28 }
 0x11a PF: > { %s16_s14 = sadd.s32 1, %s1179_s14   ;;  %s1706_s9 = smov %s1163_s10 }
 0x11b   : > { %p13_p2 = scmp.ge.s32.totalorder %s16_s14, 4   ;;  %s1707_s10 = smov %s1167_s11 }
 0x11c   : > { %s1708_s11 = smov %s1275_s8  ;;  %s1709_s12 = smov %s1175_s13 }
 0x11d   : > { %s1710_s13 = smov %s1712_s26  ;;  %15 = sbr.rel (!%p13_p2) target bundleno = 5 (0x5), region = 81 }
 0x122   :  { %843 = vsyncpa [#allocation4], 1 }
 0x123   :  { %845 = vsyncpa [#allocation4 + $0x1], 1 }
 0x124   :  { %846 = vsyncpa [#allocation5], 1 }
 0x125   :  { %848 = vsyncpa [#allocation5 + $0x1], 1 }

</bundles_post_ra>
